<compile_context>
chip_gen: v7x
topology: tpu7x:2x2x1
jax: 0.10.0
libtpu: 0.0.40
codegen_flags: <defaults>
</compile_context>

<pallas_src>
import functools

import jax
import jax.numpy as jnp
from jax.experimental import pallas as pl
from jax.experimental.pallas import tpu as pltpu

STATE_SIZE = 4
HIDDEN = 128
ACTION_SIZE = 1   # the final sublane-reduce in the kernel assumes action_size == 1
LANE = 128


def _round_up(x, m):
    return ((x + m - 1) // m) * m


def actor_kernel(x_ref, w1_ref, b1_ref, w2_ref, b2_ref, w3_ref, b3_ref, o_ref):
    """Fused 3-layer MLP in feature-major layout.

    x_ref : (STATE_SIZE, TILE_B)  state tile, batch on the lane axis (f32)
    w1_ref: (HIDDEN, STATE_SIZE)  PyTorch (out, in) layout (f32)
    b1_ref: (HIDDEN, 1)           (f32)
    w2_ref: (HIDDEN, HIDDEN)      PyTorch (out, in) layout (bf16 fast path or f32)
    b2_ref: (HIDDEN, 1)           (f32)
    w3_ref: (HIDDEN, 1)           mu weight as a column (f32)
    b3_ref: (1, 1) in SMEM        mu bias scalar
    o_ref : (1, TILE_B)           lane-dense output row (f32)
    """
    x = x_ref[...]                       # (S, TB)
    w1 = w1_ref[...]                     # (H, S)

    # ---- fc1 + ReLU: K=4 -> 4 unrolled rank-1 VPU updates (skip the MXU). ----
    h1 = b1_ref[...]                     # (H, 1), broadcasts over lanes
    for k in range(STATE_SIZE):          # static unroll
        h1 = h1 + w1[:, k:k + 1] * x[k:k + 1, :]      # (H,1)*(1,TB) -> (H,TB)
    h1 = jnp.maximum(h1, 0.0)            # (H, TB) f32

    # ---- fc2 + ReLU: the only real matmul, 128x128 on the MXU. ----
    # Cast the activation operand to the weight dtype (bf16 on the fast path)
    # and accumulate in f32 -> native MXU throughput on v5e/v6e/v7x.
    h2 = jnp.dot(w2_ref[...], h1.astype(w2_ref.dtype),
                 preferred_element_type=jnp.float32)   # (H, TB) f32
    h2 = jnp.maximum(h2 + b2_ref[...], 0.0)

    # ---- mu + tanh: N=1 -> VPU multiply + sublane reduce instead of MXU. ----
    out = jnp.sum(w3_ref[...] * h2, axis=0, keepdims=True)             # (1, TB)
    o_ref[...] = jnp.tanh(out + b3_ref[0, 0])


@functools.partial(jax.jit, static_argnames=("tile_b", "use_bf16"))
def actor_forward(state, params, *, tile_b=2048, use_bf16=True):
    """state: (B, STATE_SIZE) -> (B, ACTION_SIZE) f32.

    use_bf16=True  : fc2 MXU operands in bf16 with f32 accumulation (fast path).
    use_bf16=False : everything f32 (exact-parity validation mode).
    """
    w1, b1, w2, b2, w3, b3 = params
    B = state.shape[0]

    # Batch tile: multiple of the 128-lane width, capped at the requested
    # tile_b (default 2048, a multiple of 512 for nice vreg packing).
    tile_b = min(tile_b, _round_up(max(B, 1), LANE))
    b_pad = _round_up(B, tile_b)
    num_tiles = b_pad // tile_b

    # Feature-major input: one fused pad of the transposed state (no separate
    # zeros + scatter). Padded columns compute tanh(garbage) that is sliced off.
    x_t = jnp.pad(state.astype(jnp.float32).T, ((0, 0), (0, b_pad - B)))

    w2_mx = w2.astype(jnp.bfloat16 if use_bf16 else jnp.float32)

    out_row = pl.pallas_call(
        actor_kernel,
        out_shape=jax.ShapeDtypeStruct((1, b_pad), jnp.float32),
        grid=(num_tiles,),
        in_specs=[
            pl.BlockSpec((STATE_SIZE, tile_b), lambda i: (0, i)),   # state tile
            pl.BlockSpec((HIDDEN, STATE_SIZE), lambda i: (0, 0)),   # w1 (resident)
            pl.BlockSpec((HIDDEN, 1), lambda i: (0, 0)),            # b1
            pl.BlockSpec((HIDDEN, HIDDEN), lambda i: (0, 0)),       # w2 (resident)
            pl.BlockSpec((HIDDEN, 1), lambda i: (0, 0)),            # b2
            pl.BlockSpec((HIDDEN, 1), lambda i: (0, 0)),            # w3 column
            pl.BlockSpec(memory_space=pltpu.MemorySpace.SMEM),      # b3 scalar
        ],
        out_specs=pl.BlockSpec((1, tile_b), lambda i: (0, i)),      # lane-dense out
        compiler_params=pltpu.CompilerParams(
            dimension_semantics=("parallel",)),
    )(
        x_t,
        w1.astype(jnp.float32),
        b1.reshape(HIDDEN, 1).astype(jnp.float32),
        w2_mx,
        b2.reshape(HIDDEN, 1).astype(jnp.float32),
        w3.reshape(ACTION_SIZE, HIDDEN).T.astype(jnp.float32),      # (H, 1)
        b3.reshape(1, 1).astype(jnp.float32),
    )

    # Undo the lane-dense layout: (1, B_pad) -> (B, 1). Stays inside the jit.
    return out_row[0, :B].reshape(B, ACTION_SIZE)


def init_params(key):
    """Deterministic init with PyTorch-native (out, in) weight layouts."""
    k1, k2, k3, k4, k5, k6 = jax.random.split(key, 6)
    scale = 0.1
    w1 = scale * jax.random.normal(k1, (HIDDEN, STATE_SIZE), jnp.float32)
    b1 = scale * jax.random.normal(k2, (HIDDEN,), jnp.float32)
    w2 = scale * jax.random.normal(k3, (HIDDEN, HIDDEN), jnp.float32)
    b2 = scale * jax.random.normal(k4, (HIDDEN,), jnp.float32)
    w3 = scale * jax.random.normal(k5, (ACTION_SIZE, HIDDEN), jnp.float32)
    b3 = scale * jax.random.normal(k6, (ACTION_SIZE,), jnp.float32)
    return (w1, b1, w2, b2, w3, b3)


def actor_reference(state, params):
    """Pure-JAX reference matching the PyTorch forward exactly (all f32)."""
    w1, b1, w2, b2, w3, b3 = params
    h1 = jnp.maximum(state @ w1.T + b1, 0.0)
    h2 = jnp.maximum(h1 @ w2.T + b2, 0.0)
    return jnp.tanh(h2 @ w3.T + b3)


if __name__ == "__main__":
    key = jax.random.PRNGKey(0)
    pkey, xkey, xkey2 = jax.random.split(key, 3)
    params = init_params(pkey)

    # Small batch of CartPole states (single grid step).
    B = 8
    state = jax.random.normal(xkey, (B, STATE_SIZE), jnp.float32)
    ref = actor_reference(state, params)

    # Exact-f32 validation mode: tight tolerance.
    out_f32 = jax.block_until_ready(actor_forward(state, params, use_bf16=False))
    assert out_f32.shape == (B, ACTION_SIZE)
    assert jnp.allclose(out_f32, ref, atol=1e-5, rtol=1e-5)

    # bf16 MXU fast path: relaxed tolerance (operands rounded to bf16).
    out_bf16 = jax.block_until_ready(actor_forward(state, params, use_bf16=True))
    assert out_bf16.shape == (B, ACTION_SIZE)
    assert jnp.allclose(out_bf16, ref, atol=2e-2, rtol=2e-2)

    # Larger, non-multiple-of-tile batch to exercise the parallel grid + padding.
    B2 = 300
    state2 = jax.random.normal(xkey2, (B2, STATE_SIZE), jnp.float32)
    ref2 = actor_reference(state2, params)
    out2 = jax.block_until_ready(
        actor_forward(state2, params, tile_b=128, use_bf16=True))
    assert out2.shape == (B2, ACTION_SIZE)
    assert jnp.allclose(out2, ref2, atol=2e-2, rtol=2e-2)

    print("KERNEL_OK")
</pallas_src>

<mosaic_0001>
module attributes {stable_mosaic.version = 11 : i64} {
  func.func @actor_kernel(%arg0: i32, %arg1: memref<4x128xf32, #tpu.memory_space<vmem>>, %arg2: memref<128x4xf32, #tpu.memory_space<vmem>>, %arg3: memref<128x1xf32, #tpu.memory_space<vmem>>, %arg4: memref<128x128xf32, #tpu.memory_space<vmem>>, %arg5: memref<128x1xf32, #tpu.memory_space<vmem>>, %arg6: memref<128x1xf32, #tpu.memory_space<vmem>>, %arg7: memref<1x1xf32, #tpu.memory_space<smem>>, %arg8: memref<1x128xf32, #tpu.memory_space<vmem>>) attributes {dimension_semantics = [#tpu.dimension_semantics<parallel>], iteration_bounds = array<i64: 1>, scalar_prefetch = 0 : i64, scratch_operands = 0 : i64, tpu.core_type = #tpu.core_type<tc>, window_params = [{transform_indices = @transform_0, window_bounds = array<i64: 4, 128>}, {pipeline_mode = #tpu.pipeline_mode<synchronous>, transform_indices = @transform_1, window_bounds = array<i64: 128, 4>}, {pipeline_mode = #tpu.pipeline_mode<synchronous>, transform_indices = @transform_2, window_bounds = array<i64: 128, 1>}, {pipeline_mode = #tpu.pipeline_mode<synchronous>, transform_indices = @transform_3, window_bounds = array<i64: 128, 128>}, {pipeline_mode = #tpu.pipeline_mode<synchronous>, transform_indices = @transform_4, window_bounds = array<i64: 128, 1>}, {pipeline_mode = #tpu.pipeline_mode<synchronous>, transform_indices = @transform_5, window_bounds = array<i64: 128, 1>}, {transform_indices = @transform_6, window_bounds = array<i64: 1, 1>}, {transform_indices = @transform_7, window_bounds = array<i64: 1, 128>}]} {
    %c0 = arith.constant 0 : index
    %c0_0 = arith.constant 0 : index
    %0 = vector.load %arg1[%c0, %c0_0] : memref<4x128xf32, #tpu.memory_space<vmem>>, vector<4x128xf32>
    %c0_1 = arith.constant 0 : index
    %c0_2 = arith.constant 0 : index
    %1 = vector.load %arg2[%c0_1, %c0_2] : memref<128x4xf32, #tpu.memory_space<vmem>>, vector<128x4xf32>
    %c0_3 = arith.constant 0 : index
    %c0_4 = arith.constant 0 : index
    %2 = vector.load %arg3[%c0_3, %c0_4] : memref<128x1xf32, #tpu.memory_space<vmem>>, vector<128x1xf32>
    %3 = vector.extract_strided_slice %1 {offsets = [0, 0], sizes = [128, 1], strides = [1, 1]} : vector<128x4xf32> to vector<128x1xf32>
    %4 = vector.extract_strided_slice %0 {offsets = [0, 0], sizes = [1, 128], strides = [1, 1]} : vector<4x128xf32> to vector<1x128xf32>
    %5 = vector.broadcast %3 : vector<128x1xf32> to vector<128x128xf32>
    %6 = vector.broadcast %4 : vector<1x128xf32> to vector<128x128xf32>
    %7 = arith.mulf %5, %6 : vector<128x128xf32>
    %8 = vector.broadcast %2 : vector<128x1xf32> to vector<128x128xf32>
    %9 = arith.addf %8, %7 : vector<128x128xf32>
    %10 = vector.extract_strided_slice %1 {offsets = [0, 1], sizes = [128, 1], strides = [1, 1]} : vector<128x4xf32> to vector<128x1xf32>
    %11 = vector.extract_strided_slice %0 {offsets = [1, 0], sizes = [1, 128], strides = [1, 1]} : vector<4x128xf32> to vector<1x128xf32>
    %12 = vector.broadcast %10 : vector<128x1xf32> to vector<128x128xf32>
    %13 = vector.broadcast %11 : vector<1x128xf32> to vector<128x128xf32>
    %14 = arith.mulf %12, %13 : vector<128x128xf32>
    %15 = arith.addf %9, %14 : vector<128x128xf32>
    %16 = vector.extract_strided_slice %1 {offsets = [0, 2], sizes = [128, 1], strides = [1, 1]} : vector<128x4xf32> to vector<128x1xf32>
    %17 = vector.extract_strided_slice %0 {offsets = [2, 0], sizes = [1, 128], strides = [1, 1]} : vector<4x128xf32> to vector<1x128xf32>
    %18 = vector.broadcast %16 : vector<128x1xf32> to vector<128x128xf32>
    %19 = vector.broadcast %17 : vector<1x128xf32> to vector<128x128xf32>
    %20 = arith.mulf %18, %19 : vector<128x128xf32>
    %21 = arith.addf %15, %20 : vector<128x128xf32>
    %22 = vector.extract_strided_slice %1 {offsets = [0, 3], sizes = [128, 1], strides = [1, 1]} : vector<128x4xf32> to vector<128x1xf32>
    %23 = vector.extract_strided_slice %0 {offsets = [3, 0], sizes = [1, 128], strides = [1, 1]} : vector<4x128xf32> to vector<1x128xf32>
    %24 = vector.broadcast %22 : vector<128x1xf32> to vector<128x128xf32>
    %25 = vector.broadcast %23 : vector<1x128xf32> to vector<128x128xf32>
    %26 = arith.mulf %24, %25 : vector<128x128xf32>
    %27 = arith.addf %21, %26 : vector<128x128xf32>
    %cst = arith.constant 0.000000e+00 : f32
    %28 = vector.broadcast %cst : f32 to vector<128x128xf32>
    %29 = arith.maximumf %27, %28 : vector<128x128xf32>
    %c0_5 = arith.constant 0 : index
    %c0_6 = arith.constant 0 : index
    %30 = vector.load %arg4[%c0_5, %c0_6] : memref<128x128xf32, #tpu.memory_space<vmem>>, vector<128x128xf32>
    %cst_7 = arith.constant dense<0.000000e+00> : vector<128x128xf32>
    %31 = tpu.matmul %30, %29, %cst_7 {dimension_numbers = #tpu.dot_dimension_numbers<[1], [0], [0], [1], [0, 0, 1, 1], [], []>} : vector<128x128xf32>, vector<128x128xf32>, vector<128x128xf32> -> vector<128x128xf32>
    %c0_8 = arith.constant 0 : index
    %c0_9 = arith.constant 0 : index
    %32 = vector.load %arg5[%c0_8, %c0_9] : memref<128x1xf32, #tpu.memory_space<vmem>>, vector<128x1xf32>
    %33 = vector.broadcast %32 : vector<128x1xf32> to vector<128x128xf32>
    %34 = arith.addf %31, %33 : vector<128x128xf32>
    %cst_10 = arith.constant 0.000000e+00 : f32
    %35 = vector.broadcast %cst_10 : f32 to vector<128x128xf32>
    %36 = arith.maximumf %34, %35 : vector<128x128xf32>
    %c0_11 = arith.constant 0 : index
    %c0_12 = arith.constant 0 : index
    %37 = vector.load %arg6[%c0_11, %c0_12] : memref<128x1xf32, #tpu.memory_space<vmem>>, vector<128x1xf32>
    %38 = vector.broadcast %37 : vector<128x1xf32> to vector<128x128xf32>
    %39 = arith.mulf %38, %36 : vector<128x128xf32>
    %cst_13 = arith.constant dense<0.000000e+00> : vector<128xf32>
    %40 = vector.multi_reduction <add>, %39, %cst_13 [0] : vector<128x128xf32> to vector<128xf32>
    %41 = vector.shape_cast %40 : vector<128xf32> to vector<1x128xf32>
    %c0_14 = arith.constant 0 : index
    %c0_15 = arith.constant 0 : index
    %42 = memref.load %arg7[%c0_14, %c0_15] : memref<1x1xf32, #tpu.memory_space<smem>>
    %43 = vector.broadcast %42 : f32 to vector<1x128xf32>
    %44 = arith.addf %41, %43 : vector<1x128xf32>
    %45 = math.tanh %44 : vector<1x128xf32>
    %c0_16 = arith.constant 0 : index
    %c0_17 = arith.constant 0 : index
    %46 = vector.load %arg8[%c0_16, %c0_17] : memref<1x128xf32, #tpu.memory_space<vmem>>, vector<1x128xf32>
    tpu.vector_store %arg8[%c0_16, %c0_17], %45 {strides = array<i32>} : memref<1x128xf32, #tpu.memory_space<vmem>>, vector<1x128xf32>,
    return
  }
  func.func @transform_0(%arg0: i32) -> (i32, i32) {
    %c0_i32 = arith.constant 0 : i32
    %c0_i32_0 = arith.constant 0 : i32
    return %c0_i32, %arg0 : i32, i32
  }
  func.func @transform_1(%arg0: i32) -> (i32, i32) {
    %c0_i32 = arith.constant 0 : i32
    %c0_i32_0 = arith.constant 0 : i32
    %c0_i32_1 = arith.constant 0 : i32
    return %c0_i32, %c0_i32_0 : i32, i32
  }
  func.func @transform_2(%arg0: i32) -> (i32, i32) {
    %c0_i32 = arith.constant 0 : i32
    %c0_i32_0 = arith.constant 0 : i32
    %c0_i32_1 = arith.constant 0 : i32
    return %c0_i32, %c0_i32_0 : i32, i32
  }
  func.func @transform_3(%arg0: i32) -> (i32, i32) {
    %c0_i32 = arith.constant 0 : i32
    %c0_i32_0 = arith.constant 0 : i32
    %c0_i32_1 = arith.constant 0 : i32
    return %c0_i32, %c0_i32_0 : i32, i32
  }
  func.func @transform_4(%arg0: i32) -> (i32, i32) {
    %c0_i32 = arith.constant 0 : i32
    %c0_i32_0 = arith.constant 0 : i32
    %c0_i32_1 = arith.constant 0 : i32
    return %c0_i32, %c0_i32_0 : i32, i32
  }
  func.func @transform_5(%arg0: i32) -> (i32, i32) {
    %c0_i32 = arith.constant 0 : i32
    %c0_i32_0 = arith.constant 0 : i32
    %c0_i32_1 = arith.constant 0 : i32
    return %c0_i32, %c0_i32_0 : i32, i32
  }
  func.func @transform_6(%arg0: i32) -> (i32, i32) {
    %c0_i32 = arith.constant 0 : i32
    %c0_i32_0 = arith.constant 0 : i32
    %c0_i32_1 = arith.constant 0 : i32
    return %c0_i32, %c0_i32_0 : i32, i32
  }
  func.func @transform_7(%arg0: i32) -> (i32, i32) {
    %c0_i32 = arith.constant 0 : i32
    %c0_i32_0 = arith.constant 0 : i32
    return %c0_i32, %arg0 : i32, i32
  }
}

</mosaic_0001>

<bundles_post_ra>
// kernel: actor_forward.1
= control target key start
LH: loop header
LB: loop body
LE: loop exit
PB: predicated region body
PF: predicated region fallthrough
CT: control target
= control target key end

     0   :  { %v1168_v0 = vmov 3   ;;  %v1169_v1 = vmov 0   ;;  %v1170_v18 = vmov 1   ;;  %v1171_v20 = vmov 2   ;;  %s1761_s1 = inlined_call_operand.vmem [shape: f32[128,4], index: 1, kind: input, shape index: {}]   ;;  %s1762_s2 = inlined_call_operand.vmem [shape: f32[128,1], index: 2, kind: input, shape index: {}]   ;;  %s1763_s0 = inlined_call_operand.vmem [shape: f32[4,128], index: 0, kind: input, shape index: {}]   ;;  %s1764_s4 = inlined_call_operand.vmem [shape: f32[128,1], index: 4, kind: input, shape index: {}]   ;;  %s1765_s3 = inlined_call_operand.vmem [shape: f32[128,128], index: 3, kind: input, shape index: {}]   ;;  %s1766_s5 = inlined_call_operand.vmem [shape: f32[128,1], index: 5, kind: input, shape index: {}]   ;;  %s1767_s6 = inlined_call_operand.<no memory space> [shape: f32[1,1], index: 6, kind: input, shape index: {}]   ;;  %s1768_s7 = inlined_call_operand.vmem [shape: f32[1,128], index: 7, kind: output, shape index: {}]  }
   0x1   :  { %1133 = vset.pattern.permute.xlu0 %v1168_v0  ;;  %1127 = vset.pattern.permute.xlu1 %v1169_v1  ;;  %v1217_v2 = vld [vmem:[%s1761_s1 + $0x10] sm:$0xff]  ;;  %v1222_v3 = vld [vmem:[%s1761_s1 + $0x8] sm:$0xff]  ;;  %v1229_v4 = vld [vmem:[%s1761_s1 + $0x18] sm:$0xff]  ;;  %v140_v40 = vlaneseq }
   0x2   :  { %72 = vperm.xlu1 %1127, %v1217_v2   ;;  %461 = vperm.xlu0 %1133, %v1222_v3   ;;  %v1234_v5 = vld [vmem:[%s1761_s1 + $0x20] sm:$0xff]  ;;  %v1241_v6 = vld [vmem:[%s1761_s1 + $0x28] sm:$0xff]  ;;  %v1246_v7 = vld [vmem:[%s1761_s1 + $0x38] sm:$0xff] }
   0x3   :  { %v1253_v8 = vld [vmem:[%s1761_s1] sm:$0xff]  ;;  %v1261_v9 = vld [vmem:[%s1761_s1 + $0x48] sm:$0xff]  ;;  %v1268_v10 = vld [vmem:[%s1761_s1 + $0x58] sm:$0xff]  ;;  %v141_v43 = vshrl.u32 %v140_v40, 7 }
   0x4   :  { %v1275_v11 = vld [vmem:[%s1761_s1 + $0x68] sm:$0xff]  ;;  %v1280_v12 = vld [vmem:[%s1761_s1 + $0x30] sm:$0xff]  ;;  %v1287_v13 = vld [vmem:[%s1761_s1 + $0x78] sm:$0xff] }
   0x5   :  { %v1292_v14 = vld [vmem:[%s1761_s1 + $0x40] sm:$0xff]  ;;  %v45_v15 = vld [vmem:[%s1762_s2 + $0x8] sm:$0xff]  ;;  %v1302_v16 = vld [vmem:[%s1761_s1 + $0x50] sm:$0xff]  ;;  %v142_v47 = vsub.s32 0, %v141_v43 }
   0x6   :  { %77 = vperm.xlu1 %1127, %v1229_v4   ;;  %473 = vperm.xlu0 %1133, %v1234_v5   ;;  %v1308_v17 = vld [vmem:[%s1761_s1 + $0x60] sm:$0xff]  ;;  %v1316_v19 = vld [vmem:[%s1761_s1 + $0x70] sm:$0xff]  ;;  %v47_v24 = vld [vmem:[%s1762_s2 + $0x18] sm:$0xff] }
   0x7   :  { %v44_v21 = vld [vmem:[%s1762_s2] sm:$0xff]  ;;  %v46_v22 = vld [vmem:[%s1762_s2 + $0x10] sm:$0xff]  ;;  %v51_v25 = vld [vmem:[%s1762_s2 + $0x38] sm:$0xff] }
   0x8   :  { %v48_v23 = vld [vmem:[%s1762_s2 + $0x20] sm:$0xff]  ;;  %v54_v26 = vld [vmem:[%s1762_s2 + $0x50] sm:$0xff]  ;;  %v57_v27 = vld [vmem:[%s1762_s2 + $0x68] sm:$0xff] }
   0x9   :  { %v49_v28 = vld [vmem:[%s1762_s2 + $0x28] sm:$0xff]  ;;  %v50_v29 = vld [vmem:[%s1762_s2 + $0x30] sm:$0xff]  ;;  %v52_v30 = vld [vmem:[%s1762_s2 + $0x40] sm:$0xff] }
   0xa   :  { %87 = vperm.xlu1 %1127, %v1241_v6   ;;  %485 = vperm.xlu0 %1133, %v1246_v7   ;;  %v53_v31 = vld [vmem:[%s1762_s2 + $0x48] sm:$0xff]  ;;  %v55_v46 = vld [vmem:[%s1762_s2 + $0x58] sm:$0xff]  ;;  %v27_v49 = vld [vmem:[%s1763_s0] sm:$0xf] }
   0xb   :  { %v1435_v51 = vrot.slane %v27_v49, %v142_v47 }
   0xe   :  { %97 = vperm.xlu1 %1127, %v1246_v7   ;;  %1146 = vset.pattern.permute.xlu0 %v1169_v1 }
   0xf   :  { %62 = vperm.xlu0 %1146, %v1253_v8  }
  0x12   :  { %107 = vperm.xlu1 %1127, %v1261_v9  }
  0x13   :  { %67 = vperm.xlu0 %1146, %v1222_v3  }
  0x16   :  { %117 = vperm.xlu1 %1127, %v1268_v10  }
  0x17   :  { %82 = vperm.xlu0 %1146, %v1234_v5  }
  0x1a   :  { %127 = vperm.xlu1 %1127, %v1275_v11  }
  0x1b   :  { %92 = vperm.xlu0 %1146, %v1280_v12  }
  0x1e   :  { %137 = vperm.xlu1 %1127, %v1287_v13  }
  0x1f   :  { %102 = vperm.xlu0 %1146, %v1292_v14  }
  0x22   :  { %167 = vperm.xlu1 %1127, %v45_v15  }
  0x23   :  { %112 = vperm.xlu0 %1146, %v1302_v16  }
  0x26   :  { %1128 = vset.pattern.permute.xlu1 %v1170_v18 }
  0x27   :  { %261 = vperm.xlu1 %1128, %v1222_v3   ;;  %122 = vperm.xlu0 %1146, %v1308_v17  }
  0x2b   :  { %1129 = vset.pattern.permute.xlu1 %v1171_v20  ;;  %132 = vperm.xlu0 %1146, %v1316_v19  }
  0x2c   :  { %357 = vperm.xlu1 %1129, %v1253_v8  }
  0x2f   :  { %162 = vperm.xlu0 %1146, %v44_v21   ;;  %v522_v21 = vsub.s32 3, %v141_v43 }
  0x30   :  { %1130 = vset.pattern.permute.xlu1 %v1169_v1 }
  0x31   :  { %172 = vperm.xlu1 %1130, %v46_v22  }
  0x33   :  { %182 = vperm.xlu0 %1146, %v48_v23   ;;  %v422_v23 = vsub.s32 2, %v141_v43 }
  0x35   :  { %177 = vperm.xlu1 %1130, %v47_v24  }
  0x37   :  { %197 = vperm.xlu0 %1146, %v51_v25  }
  0x39   :  { %1131 = vset.pattern.permute.xlu1 %v1170_v18 }
  0x3a   :  { %269 = vperm.xlu1 %1131, %v1229_v4  }
  0x3b   :  { %212 = vperm.xlu0 %1146, %v54_v26  }
  0x3e   :  { %1132 = vset.pattern.permute.xlu1 %v1168_v0 }
  0x3f   :  { %227 = vperm.xlu0 %1146, %v57_v27   ;;  %457 = vperm.xlu1 %1132, %v1253_v8   ;;  %v1482_v27 = vrot.slane %v27_v49, %v522_v21 }
  0x43   :  { %1153 = vset.pattern.permute.xlu0 %v1171_v20  ;;  %1134 = vset.pattern.permute.xlu1 %v1171_v20 }
  0x44   :  { %361 = vperm.xlu0 %1153, %v1222_v3   ;;  %365 = vperm.xlu1 %1134, %v1217_v2   ;;  %v56_v3 = vld [vmem:[%s1762_s2 + $0x60] sm:$0xff] }
  0x48   :  { %373 = vperm.xlu0 %1153, %v1234_v5   ;;  %369 = vperm.xlu1 %1134, %v1229_v4  }
  0x4c   :  { %385 = vperm.xlu0 %1153, %v1246_v7   ;;  %1135 = vset.pattern.permute.xlu1 %v1169_v1 }
  0x4d   :  { %187 = vperm.xlu1 %1135, %v49_v28  }
  0x50   :  { %397 = vperm.xlu0 %1153, %v1302_v16  }
  0x51   :  { %1136 = vset.pattern.permute.xlu1 %v1170_v18 }
  0x52   :  { %273 = vperm.xlu1 %1136, %v1234_v5  }
  0x54   :  { %409 = vperm.xlu0 %1153, %v1275_v11  }
  0x56   :  { %1137 = vset.pattern.permute.xlu1 %v1168_v0 }
  0x57   :  { %465 = vperm.xlu1 %1137, %v1217_v2  }
  0x58   :  { %1157 = vset.pattern.permute.xlu0 %v1170_v18 }
  0x59   :  { %257 = vperm.xlu0 %1157, %v1253_v8   ;;  %v322_v8 = vsub.s32 1, %v141_v43 }
  0x5b   :  { %469 = vperm.xlu1 %1137, %v1229_v4   ;;  %v1473_v15 = vrot.slane %v27_v49, %v322_v8 }
  0x5d   :  { %265 = vperm.xlu0 %1157, %v1217_v2  }
  0x5f   :  { %1138 = vset.pattern.permute.xlu1 %v1171_v20 }
  0x60   :  { %377 = vperm.xlu1 %1138, %v1241_v6  }
  0x61   :  { %277 = vperm.xlu0 %1157, %v1241_v6  }
  0x64   :  { %1139 = vset.pattern.permute.xlu1 %v1169_v1 }
  0x65   :  { %192 = vperm.xlu1 %1139, %v50_v29   ;;  %289 = vperm.xlu0 %1157, %v1292_v14   ;;  %v1484_v29 = vrot.slane %v27_v49, %v422_v23 }
  0x69   :  { %1140 = vset.pattern.permute.xlu1 %v1170_v18  ;;  %301 = vperm.xlu0 %1157, %v1268_v10  }
  0x6a   :  { %281 = vperm.xlu1 %1140, %v1280_v12  }
  0x6d   :  { %313 = vperm.xlu0 %1157, %v1316_v19  }
  0x6e   :  { %285 = vperm.xlu1 %1140, %v1246_v7  }
  0x71   :  { %1159 = vset.pattern.permute.xlu0 %v1168_v0 }
  0x72   :  { %1141 = vset.pattern.permute.xlu1 %v1168_v0  ;;  %497 = vperm.xlu0 %1159, %v1302_v16  }
  0x73   :  { %477 = vperm.xlu1 %1141, %v1241_v6  }
  0x76   :  { %509 = vperm.xlu0 %1159, %v1275_v11  }
  0x77   :  { %1142 = vset.pattern.permute.xlu1 %v1171_v20 }
  0x78   :  { %381 = vperm.xlu1 %1142, %v1280_v12  }
  0x7a   :  { %513 = vperm.xlu0 %1159, %v1316_v19  }
  0x7c   :  { %1143 = vset.pattern.permute.xlu1 %v1169_v1 }
  0x7d   :  { %202 = vperm.xlu1 %1143, %v52_v30  }
  0x7e   :  { %1164 = vset.pattern.permute.xlu0 %v1169_v1 }
  0x81   :  { %v1397_v32 = vpop.permute.xlu1 %72  ;;  %207 = vperm.xlu1 %1143, %v53_v31   ;;  %v1399_v33 = vpop.permute.xlu0 %461 }
  0x82   :  { %v525_v40 = vmul.f32 %v1482_v27, %v1399_v33  ;;  %v59_v33 = vld [vmem:[%s1762_s2 + $0x78] sm:$0xff] }
  0x85   :  { %v1401_v34 = vpop.permute.xlu1 %77  ;;  %1144 = vset.pattern.permute.xlu1 %v1170_v18  ;;  %v1404_v35 = vpop.permute.xlu0 %473 }
  0x86   :  { %293 = vperm.xlu1 %1144, %v1261_v9  }
  0x89   :  { %v1407_v36 = vpop.permute.xlu1 %87  ;;  %v1409_v37 = vpop.permute.xlu0 %485 }
  0x8a   :  { %1145 = vset.pattern.permute.xlu1 %v1168_v0 }
  0x8b   :  { %481 = vperm.xlu1 %1145, %v1280_v12  }
  0x8d   :  { %v1413_v38 = vpop.permute.xlu1 %97 }
  0x8e   :  { %v1415_v39 = vpop.permute.xlu0 %62 }
  0x8f   :  { %1147 = vset.pattern.permute.xlu1 %v1171_v20  ;;  %v144_v8 = vmul.f32 %v1435_v51, %v1415_v39 }
  0x90   :  { %389 = vperm.xlu1 %1147, %v1292_v14  }
  0x91   :  { %v1419_v41 = vpop.permute.xlu1 %107 }
  0x92   :  { %v68_v42 = vpop.permute.xlu0 %67 }
  0x93   :  { %v145_v22 = vmul.f32 %v1435_v51, %v68_v42 }
  0x94   :  { %393 = vperm.xlu1 %1147, %v1261_v9  }
  0x95   :  { %v1422_v44 = vpop.permute.xlu1 %117 }
  0x96   :  { %v1424_v45 = vpop.permute.xlu0 %82 }
  0x98   :  { %1148 = vset.pattern.permute.xlu1 %v1169_v1 }
  0x99   :  { %v128_v48 = vpop.permute.xlu1 %127  ;;  %217 = vperm.xlu1 %1148, %v55_v46   ;;  %v58_v46 = vld [vmem:[%s1762_s2 + $0x70] sm:$0xff] }
  0x9a   :  { %v1433_v50 = vpop.permute.xlu0 %92 }
  0x9d   :  { %v1437_v52 = vpop.permute.xlu1 %137  ;;  %1149 = vset.pattern.permute.xlu1 %v1170_v18 }
  0x9e   :  { %v103_v53 = vpop.permute.xlu0 %102  ;;  %297 = vperm.xlu1 %1149, %v1302_v16   ;;  %v157_v16 = vmul.f32 %v1435_v51, %v128_v48 }
  0x9f   :  { %v1442_v54 = vmul.f32 %v1435_v51, %v103_v53 }
  0xa1   :  { %v168_v55 = vpop.permute.xlu1 %167 }
  0xa2   :  { %v113_v56 = vpop.permute.xlu0 %112  ;;  %1150 = vset.pattern.permute.xlu1 %v1168_v0  ;;  %v241_v28 = vadd.f32 %v168_v55, %v145_v22  ;;  %v148_v55 = vmul.f32 %v1435_v51, %v1424_v45  ;;  %v528_v45 = vmul.f32 %v1482_v27, %v1404_v35  ;;  %v147_v22 = vmul.f32 %v1435_v51, %v1401_v34 }
  0xa3   :  { %v154_v57 = vmul.f32 %v1435_v51, %v113_v56  ;;  %489 = vperm.xlu1 %1150, %v1292_v14   ;;  %v146_v35 = vmul.f32 %v1435_v51, %v1397_v32 }
  0xa6   :  { %v262_v58 = vpop.permute.xlu1 %261  ;;  %v123_v59 = vpop.permute.xlu0 %122 }
  0xa7   :  { %v1448_v60 = vmul.f32 %v1435_v51, %v123_v59  ;;  %493 = vperm.xlu1 %1150, %v1261_v9  }
  0xaa   :  { %v133_v61 = vpop.permute.xlu0 %132 }
  0xab   :  { %v1452_v62 = vmul.f32 %v1435_v51, %v133_v61  ;;  %1151 = vset.pattern.permute.xlu1 %v1171_v20  ;;  %v1455_v63 = vpop.permute.xlu1 %357 }
  0xac   :  { %401 = vperm.xlu1 %1151, %v1268_v10  }
  0xae   :  { %v163_v2 = vpop.permute.xlu0 %162 }
  0xb0   :  { %1152 = vset.pattern.permute.xlu1 %v1169_v1  ;;  %v1462_v4 = vpop.permute.xlu1 %172 }
  0xb1   :  { %222 = vperm.xlu1 %1152, %v56_v3   ;;  %v242_v34 = vadd.f32 %v1462_v4, %v146_v35  ;;  %v591_v35 = vld [vmem:[%s1764_s4 + $0x18] sm:$0xff] }
  0xb2   :  { %v183_v5 = vpop.permute.xlu0 %182 }
  0xb4   :  { %v1464_v6 = vpop.permute.xlu1 %177 }
  0xb5   :  { %1154 = vset.pattern.permute.xlu1 %v1170_v18 }
  0xb6   :  { %v1467_v7 = vpop.permute.xlu0 %197  ;;  %305 = vperm.xlu1 %1154, %v1308_v17  }
  0xb9   :  { %v270_v9 = vpop.permute.xlu1 %269 }
  0xba   :  { %v213_v12 = vpop.permute.xlu0 %212  ;;  %309 = vperm.xlu1 %1154, %v1275_v11   ;;  %v325_v11 = vmul.f32 %v1473_v15, %v262_v58  ;;  %v244_v58 = vadd.f32 %v183_v5, %v148_v55  ;;  %v240_v5 = vadd.f32 %v163_v2, %v144_v8  ;;  %v327_v23 = vmul.f32 %v1473_v15, %v270_v9 }
  0xbb   :  { %v1471_v14 = vadd.f32 %v213_v12, %v154_v57  ;;  %v424_v2 = vmul.f32 %v1484_v29, %v1455_v63 }
  0xbc   :  { %v341_v42 = vadd.f32 %v325_v11, %v241_v28  ;;  %v243_v28 = vadd.f32 %v1464_v6, %v147_v22 }
  0xbe   :  { %v228_v24 = vpop.permute.xlu0 %227  ;;  %1155 = vset.pattern.permute.xlu1 %v1168_v0  ;;  %v458_v25 = vpop.permute.xlu1 %457  ;;  %v343_v9 = vadd.f32 %v327_v23, %v243_v28  ;;  %v531_v28 = vmul.f32 %v1482_v27, %v1409_v37 }
  0xbf   :  { %v1478_v26 = vadd.f32 %v228_v24, %v157_v16  ;;  %501 = vperm.xlu1 %1155, %v1268_v10  }
  0xc3   :  { %v362_v30 = vpop.permute.xlu0 %361  ;;  %1156 = vset.pattern.permute.xlu1 %v1171_v20  ;;  %v366_v31 = vpop.permute.xlu1 %365 }
  0xc4   :  { %v425_v43 = vmul.f32 %v1484_v29, %v362_v30  ;;  %405 = vperm.xlu1 %1156, %v1308_v17   ;;  %v426_v63 = vmul.f32 %v1484_v29, %v366_v31 }
  0xc6   :  { %v441_v10 = vadd.f32 %v425_v43, %v341_v42  ;;  %v524_v43 = vmul.f32 %v1482_v27, %v458_v25 }
  0xc7   :  { %v370_v47 = vpop.permute.xlu1 %369  ;;  %v374_v48 = vpop.permute.xlu0 %373 }
  0xc8   :  { %v541_v49 = vadd.f32 %v525_v40, %v441_v10  ;;  %1158 = vset.pattern.permute.xlu1 %v1169_v1  ;;  %v428_v61 = vmul.f32 %v1484_v29, %v374_v48 }
  0xc9   :  { %232 = vperm.xlu1 %1158, %v58_v46  }
  0xcb   :  { %v1498_v53 = vpop.permute.xlu0 %385 }
  0xcc   :  { %v1502_v56 = vpop.permute.xlu1 %187  ;;  %v431_v22 = vmul.f32 %v1484_v29, %v1498_v53 }
  0xcd   :  { %237 = vperm.xlu1 %1158, %v59_v33  }
  0xcf   :  { %v1504_v57 = vpop.permute.xlu0 %397 }
  0xd1   :  { %1160 = vset.pattern.permute.xlu1 %v1170_v18  ;;  %v274_v59 = vpop.permute.xlu1 %273 }
  0xd2   :  { %v328_v3 = vmul.f32 %v1473_v15, %v274_v59  ;;  %317 = vperm.xlu1 %1160, %v1287_v13  }
  0xd3   :  { %v1512_v12 = vpop.permute.xlu0 %409 }
  0xd4   :  { %v344_v16 = vadd.f32 %v328_v3, %v244_v58 }
  0xd6   :  { %v444_v21 = vadd.f32 %v428_v61, %v344_v16  ;;  %1161 = vset.pattern.permute.xlu1 %v1168_v0  ;;  %v466_v18 = vpop.permute.xlu1 %465 }
  0xd7   :  { %505 = vperm.xlu1 %1161, %v1308_v17   ;;  %v427_v17 = vmul.f32 %v1484_v29, %v370_v47  ;;  %v526_v4 = vmul.f32 %v1482_v27, %v466_v18 }
  0xd8   :  { %v1521_v24 = vadd.f32 %v528_v45, %v444_v21  ;;  %v258_v39 = vpop.permute.xlu0 %257 }
  0xd9   :  { %v324_v11 = vmul.f32 %v1473_v15, %v258_v39  ;;  %v443_v46 = vadd.f32 %v427_v17, %v343_v9 }
  0xda   :  { %v470_v30 = vpop.permute.xlu1 %469 }
  0xdb   :  { %v340_v40 = vadd.f32 %v324_v11, %v240_v5  ;;  %1162 = vset.pattern.permute.xlu1 %v1171_v20  ;;  %v527_v6 = vmul.f32 %v1482_v27, %v470_v30  ;;  %v557_v20 = vmax.f32 %v541_v49, 0.0  ;;  %v590_v11 = vld [vmem:[%s1764_s4 + $0x10] sm:$0xff] }
  0xdc   :  { %v266_v42 = vpop.permute.xlu0 %265  ;;  %413 = vperm.xlu1 %1162, %v1316_v19  }
  0xdd   :  { %v440_v32 = vadd.f32 %v424_v2, %v340_v40  ;;  %v326_v10 = vmul.f32 %v1473_v15, %v266_v42  ;;  %v543_v19 = vadd.f32 %v527_v6, %v443_v46  ;;  %v845_v42 = vld [vmem:[%s1766_s5] sm:$0xff]  ;;  %v847_v46 = vld [vmem:[%s1766_s5 + $0x10] sm:$0xff] }
  0xdf   :  { %v540_v47 = vadd.f32 %v524_v43, %v440_v32  ;;  %v342_v48 = vadd.f32 %v326_v10, %v242_v34  ;;  %v378_v33 = vpop.permute.xlu1 %377  ;;  %v559_v3 = vmax.f32 %v543_v19, 0.0  ;;  %v846_v43 = vld [vmem:[%s1766_s5 + $0x8] sm:$0xff]  ;;  %v560_v32 = vmax.f32 %v1521_v24, 0.0 }
  0xe0   :  { %417 = vperm.xlu1 %1162, %v1287_v13   ;;  %v278_v8 = vpop.permute.xlu0 %277  ;;  %v593_v24 = vld [vmem:[%s1764_s4 + $0x28] sm:$0xff] }
  0xe1   :  { %v556_v55 = vmax.f32 %v540_v47, 0.0  ;;  %v442_v58 = vadd.f32 %v426_v63, %v342_v48  ;;  %v329_v16 = vmul.f32 %v1473_v15, %v278_v8  ;;  %v592_v63 = vld [vmem:[%s1764_s4 + $0x20] sm:$0xff]  ;;  %v848_v48 = vld [vmem:[%s1766_s5 + $0x18] sm:$0xff] }
  0xe2   :  { %v596_v8 = vld [vmem:[%s1764_s4 + $0x40] sm:$0xff] }
  0xe3   :  { %v542_v25 = vadd.f32 %v526_v4, %v442_v58  ;;  %v1075_v59 = vpack.c.bf16 %v557_v20, %v556_v55  ;;  %v594_v20 = vld [vmem:[%s1764_s4 + $0x30] sm:$0xff]  ;;  %v849_v4 = vld [vmem:[%s1766_s5 + $0x20] sm:$0xff]  ;;  %v150_v55 = vmul.f32 %v1435_v51, %v1433_v50 }
  0xe4   :  { %1163 = vset.pattern.permute.xlu1 %v1168_v0  ;;  %v1540_v61 = vpop.permute.xlu1 %192  ;;  %v149_v0 = vmul.f32 %v1435_v51, %v1407_v36  ;;  %v588_v36 = vld [vmem:[%s1764_s4] sm:$0xff] }
  0xe5   :  { %v558_v31 = vmax.f32 %v542_v25, 0.0  ;;  %517 = vperm.xlu1 %1163, %v1287_v13   ;;  %1076 = vmatprep.subr.bf16.mxu0 %v1075_v59  ;;  %v151_v13 = vmul.f32 %v1435_v51, %v1413_v38  ;;  %v572_v38 = vld [vmem:[%s1765_s3] sm:$0xff]  ;;  %v595_v25 = vld [vmem:[%s1764_s4 + $0x38] sm:$0xff] }
  0xe6   :  { %1107 = vmatprep.subr.bf16.mxu1 %v1075_v59  ;;  %1078 = vmatpush3.bf16.msra.mxu0 %v1075_v59  ;;  %v245_v21 = vadd.f32 %v1502_v56, %v149_v0  ;;  %v429_v56 = vmul.f32 %v1484_v29, %v378_v33 }
  0xe7   :  { %1115 = vmatpush3.bf16.msra.mxu1 %v1075_v59  ;;  %v1079_v49 = vpack.c.bf16 %v559_v3, %v558_v31  ;;  %v247_v5 = vadd.f32 %v1467_v7, %v151_v13  ;;  %v580_v7 = vld [vmem:[%s1765_s3 + $0x40] sm:$0xff]  ;;  %606 = vperm.xlu0 %1164, %v588_v36   ;;  %v850_v59 = vld [vmem:[%s1766_s5 + $0x28] sm:$0xff]  ;;  %v246_v3 = vadd.f32 %v1540_v61, %v150_v55 }
  0xe8   :  { %v345_v39 = vadd.f32 %v329_v16, %v245_v21  ;;  %1051 = vmatprep.mubr.f32.mxu0 %v572_v38  ;;  %1063 = vmatprep.mubr.f32.mxu1 %v580_v7  ;;  %v597_v61 = vld [vmem:[%s1764_s4 + $0x48] sm:$0xff]  ;;  %v852_v21 = vld [vmem:[%s1766_s5 + $0x38] sm:$0xff]  ;;  %v853_v36 = vld [vmem:[%s1766_s5 + $0x40] sm:$0xff] }
  0xe9   :  { %v1543_v45 = vpop.permute.xlu1 %281  ;;  %1080 = vmatprep.subr.bf16.mxu0 %v1079_v49  ;;  %1108 = vmatprep.subr.bf16.mxu1 %v1079_v49  ;;  %v599_v38 = vld [vmem:[%s1764_s4 + $0x58] sm:$0xff]  ;;  %v854_v7 = vld [vmem:[%s1766_s5 + $0x48] sm:$0xff] }
  0xea   :  { %1082 = vmatpush3.bf16.msra.mxu0 %v1079_v49  ;;  %1165 = vset.pattern.permute.xlu1 %v1169_v1  ;;  %v589_v1 = vld [vmem:[%s1764_s4 + $0x8] sm:$0xff]  ;;  %v445_v17 = vadd.f32 %v429_v56, %v345_v39  ;;  %v330_v19 = vmul.f32 %v1473_v15, %v1543_v45  ;;  %v851_v45 = vld [vmem:[%s1766_s5 + $0x30] sm:$0xff]  ;;  %v600_v56 = vld [vmem:[%s1764_s4 + $0x60] sm:$0xff] }
  0xeb   :  { %1116 = vmatpush3.bf16.msra.mxu1 %v1079_v49  ;;  %611 = vperm.xlu1 %1165, %v589_v1   ;;  %v598_v1 = vld [vmem:[%s1764_s4 + $0x50] sm:$0xff] }
  0xec   :  { %621 = vperm.xlu0 %1164, %v591_v35   ;;  %v346_v49 = vadd.f32 %v330_v19, %v246_v3  ;;  %v290_v35 = vpop.permute.xlu0 %289 }
  0xed   :  { %v286_v18 = vpop.permute.xlu1 %285 }
  0xee   :  { %v331_v23 = vmul.f32 %v1473_v15, %v286_v18 }
  0xef   :  { %616 = vperm.xlu1 %1165, %v590_v11   ;;  %v855_v11 = vld [vmem:[%s1766_s5 + $0x50] sm:$0xff] }
  0xf0   :  { %v347_v53 = vadd.f32 %v331_v23, %v247_v5  ;;  %868 = vperm.xlu0 %1164, %v846_v43  }
  0xf2   :  { %v447_v30 = vadd.f32 %v431_v22, %v347_v53  ;;  %v478_v2 = vpop.permute.xlu1 %477 }
  0xf3   :  { %v529_v40 = vmul.f32 %v1482_v27, %v478_v2  ;;  %863 = vperm.xlu1 %1165, %v845_v42  }
  0xf4   :  { %v547_v34 = vadd.f32 %v531_v28, %v447_v30  ;;  %873 = vperm.xlu0 %1164, %v847_v46   ;;  %v434_v30 = vmul.f32 %v1484_v29, %v1504_v57  ;;  %v153_v57 = vmul.f32 %v1435_v51, %v1419_v41 }
  0xf5   :  { %v545_v9 = vadd.f32 %v529_v40, %v445_v17  ;;  %v601_v17 = vld [vmem:[%s1764_s4 + $0x68] sm:$0xff]  ;;  %v856_v40 = vld [vmem:[%s1766_s5 + $0x58] sm:$0xff] }
  0xf6   :  { %v563_v5 = vmax.f32 %v547_v34, 0.0  ;;  %v332_v34 = vmul.f32 %v1473_v15, %v290_v35 }
  0xf7   :  { %v561_v37 = vmax.f32 %v545_v9, 0.0  ;;  %v382_v6 = vpop.permute.xlu1 %381  ;;  %626 = vperm.xlu1 %1165, %v592_v63  }
  0xf8   :  { %878 = vperm.xlu0 %1164, %v848_v48   ;;  %v430_v31 = vmul.f32 %v1484_v29, %v382_v6 }
  0xf9   :  { %v1083_v10 = vpack.c.bf16 %v561_v37, %v560_v32 }
  0xfa   :  { %v446_v0 = vadd.f32 %v430_v31, %v346_v49 }
  0xfb   :  { %1084 = vmatprep.subr.bf16.mxu0 %v1083_v10  ;;  %1109 = vmatprep.subr.bf16.mxu1 %v1083_v10 }
  0xfc   :  { %v1591_v47 = vpop.permute.xlu1 %202  ;;  %1086 = vmatpush3.bf16.msra.mxu0 %v1083_v10  ;;  %1117 = vmatpush3.bf16.msra.mxu1 %v1083_v10  ;;  %v602_v10 = vld [vmem:[%s1764_s4 + $0x70] sm:$0xff] }
  0xfd   :  { %631 = vperm.xlu1 %1165, %v593_v24   ;;  %883 = vperm.xlu0 %1164, %v849_v4   ;;  %v248_v9 = vadd.f32 %v1591_v47, %v1442_v54  ;;  %v857_v54 = vld [vmem:[%s1766_s5 + $0x60] sm:$0xff]  ;;  %v858_v4 = vld [vmem:[%s1766_s5 + $0x68] sm:$0xff] }
 0x100   :  { %v1599_v33 = vpop.permute.xlu1 %207 }
 0x101   :  { %636 = vperm.xlu1 %1165, %v594_v20   ;;  %888 = vperm.xlu0 %1164, %v850_v59   ;;  %v249_v63 = vadd.f32 %v1599_v33, %v153_v57  ;;  %v603_v20 = vld [vmem:[%s1764_s4 + $0x78] sm:$0xff] }
 0x102   :  { %v860_v59 = vld [vmem:[%s1766_s5 + $0x78] sm:$0xff] }
 0x105   :  { %v294_v58 = vpop.permute.xlu1 %293  ;;  %641 = vperm.xlu1 %1165, %v595_v25   ;;  %893 = vperm.xlu0 %1164, %v851_v45   ;;  %v859_v25 = vld [vmem:[%s1766_s5 + $0x70] sm:$0xff] }
 0x106   :  { %v333_v43 = vmul.f32 %v1473_v15, %v294_v58 }
 0x108   :  { %v349_v47 = vadd.f32 %v333_v43, %v249_v63 }
 0x109   :  { %646 = vperm.xlu1 %1165, %v596_v8   ;;  %898 = vperm.xlu0 %1164, %v852_v21  }
 0x10a   :  { %v482_v50 = vpop.permute.xlu1 %481 }
 0x10b   :  { %v530_v16 = vmul.f32 %v1482_v27, %v482_v50  ;;  %v302_v50 = vpop.permute.xlu0 %301 }
 0x10c   :  { %v335_v21 = vmul.f32 %v1473_v15, %v302_v50 }
 0x10d   :  { %v546_v13 = vadd.f32 %v530_v16, %v446_v0  ;;  %651 = vperm.xlu1 %1165, %v597_v61   ;;  %903 = vperm.xlu0 %1164, %v853_v36   ;;  %v437_v36 = vmul.f32 %v1484_v29, %v1512_v12 }
 0x10f   :  { %v562_v18 = vmax.f32 %v546_v13, 0.0  ;;  %v390_v22 = vpop.permute.xlu1 %389  ;;  %v314_v0 = vpop.permute.xlu0 %313  ;;  %v155_v13 = vmul.f32 %v1435_v51, %v1422_v44 }
 0x110   :  { %v432_v32 = vmul.f32 %v1484_v29, %v390_v22 }
 0x111   :  { %v1087_v23 = vpack.c.bf16 %v563_v5, %v562_v18  ;;  %656 = vperm.xlu1 %1165, %v598_v1   ;;  %908 = vperm.xlu0 %1164, %v854_v7  }
 0x113   :  { %v394_v39 = vpop.permute.xlu1 %393  ;;  %1088 = vmatprep.subr.bf16.mxu0 %v1087_v23  ;;  %1110 = vmatprep.subr.bf16.mxu1 %v1087_v23  ;;  %v498_v61 = vpop.permute.xlu0 %497 }
 0x114   :  { %1090 = vmatpush3.bf16.msra.mxu0 %v1087_v23  ;;  %1118 = vmatpush3.bf16.msra.mxu1 %v1087_v23  ;;  %v433_v41 = vmul.f32 %v1484_v29, %v394_v39  ;;  %v534_v23 = vmul.f32 %v1482_v27, %v498_v61  ;;  %v583_v61 = vld [vmem:[%s1765_s3 + $0x58] sm:$0xff] }
 0x115   :  { %661 = vperm.xlu1 %1165, %v599_v38   ;;  %913 = vperm.xlu0 %1164, %v855_v11  }
 0x116   :  { %v449_v55 = vadd.f32 %v433_v41, %v349_v47 }
 0x118   :  { %v218_v53 = vpop.permute.xlu1 %217 }
 0x119   :  { %666 = vperm.xlu1 %1165, %v600_v56   ;;  %918 = vperm.xlu0 %1164, %v856_v40   ;;  %v251_v18 = vadd.f32 %v218_v53, %v155_v13  ;;  %v575_v13 = vld [vmem:[%s1765_s3 + $0x18] sm:$0xff] }
 0x11b   :  { %v351_v38 = vadd.f32 %v335_v21, %v251_v18  ;;  %v576_v21 = vld [vmem:[%s1765_s3 + $0x20] sm:$0xff] }
 0x11c   :  { %v584_v18 = vld [vmem:[%s1765_s3 + $0x60] sm:$0xff] }
 0x11d   :  { %v298_v28 = vpop.permute.xlu1 %297  ;;  %671 = vperm.xlu1 %1165, %v601_v17   ;;  %923 = vperm.xlu0 %1164, %v857_v54  }
 0x11e   :  { %v334_v2 = vmul.f32 %v1473_v15, %v298_v28 }
 0x120   :  { %v350_v42 = vadd.f32 %v334_v2, %v1471_v14  ;;  %v348_v14 = vadd.f32 %v332_v34, %v248_v9  ;;  %v510_v34 = vpop.permute.xlu0 %509 }
 0x121   :  { %676 = vperm.xlu1 %1165, %v602_v10   ;;  %928 = vperm.xlu0 %1164, %v858_v4   ;;  %v537_v57 = vmul.f32 %v1482_v27, %v510_v34  ;;  %v159_v4 = vmul.f32 %v1435_v51, %v1437_v52 }
 0x122   :  { %v450_v37 = vadd.f32 %v434_v30, %v350_v42  ;;  %v490_v6 = vpop.permute.xlu1 %489  ;;  %v448_v24 = vadd.f32 %v432_v32, %v348_v14 }
 0x123   :  { %v532_v46 = vmul.f32 %v1482_v27, %v490_v6 }
 0x124   :  { %v550_v44 = vadd.f32 %v534_v23, %v450_v37  ;;  %v578_v23 = vld [vmem:[%s1765_s3 + $0x30] sm:$0xff] }
 0x125   :  { %v548_v19 = vadd.f32 %v532_v46, %v448_v24  ;;  %681 = vperm.xlu1 %1165, %v603_v20   ;;  %938 = vperm.xlu0 %1164, %v860_v59   ;;  %v338_v24 = vmul.f32 %v1473_v15, %v314_v0  ;;  %v514_v20 = vpop.permute.xlu0 %513  ;;  %v573_v0 = vld [vmem:[%s1765_s3 + $0x8] sm:$0xff] }
 0x126   :  { %v494_v48 = vpop.permute.xlu1 %493  ;;  %v566_v28 = vmax.f32 %v550_v44, 0.0 }
 0x127   :  { %v533_v33 = vmul.f32 %v1482_v27, %v494_v48  ;;  %v564_v3 = vmax.f32 %v548_v19, 0.0 }
 0x129   :  { %v549_v58 = vadd.f32 %v533_v33, %v449_v55  ;;  %933 = vperm.xlu1 %1165, %v859_v25   ;;  %v538_v25 = vmul.f32 %v1482_v27, %v514_v20 }
 0x12b   :  { %v565_v31 = vmax.f32 %v549_v58, 0.0  ;;  %v402_v49 = vpop.permute.xlu1 %401 }
 0x12c   :  { %v435_v1 = vmul.f32 %v1484_v29, %v402_v49 }
 0x12d   :  { %v1091_v8 = vpack.c.bf16 %v565_v31, %v564_v3 }
 0x12e   :  { %v451_v11 = vadd.f32 %v435_v1, %v351_v38  ;;  %v586_v1 = vld [vmem:[%s1765_s3 + $0x70] sm:$0xff] }
 0x12f   :  { %1092 = vmatprep.subr.bf16.mxu0 %v1091_v8  ;;  %1111 = vmatprep.subr.bf16.mxu1 %v1091_v8 }
 0x130   :  { %v223_v45 = vpop.permute.xlu1 %222  ;;  %1094 = vmatpush3.bf16.msra.mxu0 %v1091_v8  ;;  %1119 = vmatpush3.bf16.msra.mxu1 %v1091_v8 }
 0x131   :  { %v252_v42 = vadd.f32 %v223_v45, %v1448_v60 }
 0x135   :  { %v306_v16 = vpop.permute.xlu1 %305 }
 0x139   :  { %v310_v5 = vpop.permute.xlu1 %309 }
 0x13a   :  { %v337_v22 = vmul.f32 %v1473_v15, %v310_v5  ;;  %v577_v5 = vld [vmem:[%s1765_s3 + $0x28] sm:$0xff] }
 0x13c   :  { %v353_v39 = vadd.f32 %v337_v22, %v1478_v26  ;;  %v336_v26 = vmul.f32 %v1473_v15, %v306_v16  ;;  %v582_v16 = vld [vmem:[%s1765_s3 + $0x50] sm:$0xff]  ;;  %v585_v22 = vld [vmem:[%s1765_s3 + $0x68] sm:$0xff] }
 0x13e   :  { %v453_v7 = vadd.f32 %v437_v36, %v353_v39  ;;  %v502_v56 = vpop.permute.xlu1 %501  ;;  %v352_v32 = vadd.f32 %v336_v26, %v252_v42  ;;  %v579_v36 = vld [vmem:[%s1765_s3 + $0x38] sm:$0xff] }
 0x13f   :  { %v535_v35 = vmul.f32 %v1482_v27, %v502_v56  ;;  %v587_v39 = vld [vmem:[%s1765_s3 + $0x78] sm:$0xff] }
 0x140   :  { %v553_v6 = vadd.f32 %v537_v57, %v453_v7 }
 0x141   :  { %v551_v53 = vadd.f32 %v535_v35, %v451_v11 }
 0x142   :  { %v569_v63 = vmax.f32 %v553_v6, 0.0 }
 0x143   :  { %v567_v30 = vmax.f32 %v551_v53, 0.0  ;;  %v406_v2 = vpop.permute.xlu1 %405 }
 0x144   :  { %v436_v43 = vmul.f32 %v1484_v29, %v406_v2 }
 0x145   :  { %v1095_v17 = vpack.c.bf16 %v567_v30, %v566_v28 }
 0x146   :  { %v452_v10 = vadd.f32 %v436_v43, %v352_v32 }
 0x147   :  { %1096 = vmatprep.subr.bf16.mxu0 %v1095_v17  ;;  %1112 = vmatprep.subr.bf16.mxu1 %v1095_v17 }
 0x148   :  { %v233_v40 = vpop.permute.xlu1 %232  ;;  %1098 = vmatpush3.bf16.msra.mxu0 %v1095_v17  ;;  %1120 = vmatpush3.bf16.msra.mxu1 %v1095_v17 }
 0x149   :  { %v254_v41 = vadd.f32 %v233_v40, %v1452_v62 }
 0x14b   :  { %v354_v55 = vadd.f32 %v338_v24, %v254_v41 }
 0x14c   :  { %v238_v12 = vpop.permute.xlu1 %237 }
 0x14d   :  { %v255_v62 = vadd.f32 %v238_v12, %v159_v4 }
 0x151   :  { %v318_v9 = vpop.permute.xlu1 %317 }
 0x152   :  { %v339_v19 = vmul.f32 %v1473_v15, %v318_v9 }
 0x154   :  { %v355_v3 = vadd.f32 %v339_v19, %v255_v62 }
 0x156   :  { %v506_v37 = vpop.permute.xlu1 %505 }
 0x157   :  { %v536_v54 = vmul.f32 %v1482_v27, %v506_v37 }
 0x159   :  { %v552_v14 = vadd.f32 %v536_v54, %v452_v10 }
 0x15b   :  { %v568_v46 = vmax.f32 %v552_v14, 0.0  ;;  %v414_v47 = vpop.permute.xlu1 %413 }
 0x15c   :  { %v438_v60 = vmul.f32 %v1484_v29, %v414_v47 }
 0x15d   :  { %v1099_v48 = vpack.c.bf16 %v569_v63, %v568_v46 }
 0x15e   :  { %v454_v58 = vadd.f32 %v438_v60, %v354_v55 }
 0x15f   :  { %v418_v33 = vpop.permute.xlu1 %417  ;;  %1100 = vmatprep.subr.bf16.mxu0 %v1099_v48  ;;  %1113 = vmatprep.subr.bf16.mxu1 %v1099_v48 }
 0x160   :  { %1102 = vmatpush3.bf16.msra.mxu0 %v1099_v48  ;;  %1121 = vmatpush3.bf16.msra.mxu1 %v1099_v48  ;;  %v439_v59 = vmul.f32 %v1484_v29, %v418_v33  ;;  %v554_v49 = vadd.f32 %v538_v25, %v454_v58  ;;  %v581_v29 = vld [vmem:[%s1765_s3 + $0x48] sm:$0xff] }
 0x162   :  { %v455_v50 = vadd.f32 %v439_v59, %v355_v3  ;;  %v570_v8 = vmax.f32 %v554_v49, 0.0 }
 0x164   :  { %v518_v31 = vpop.permute.xlu1 %517 }
 0x165   :  { %v539_v51 = vmul.f32 %v1482_v27, %v518_v31  ;;  %v574_v27 = vld [vmem:[%s1765_s3 + $0x10] sm:$0xff] }
 0x166   :  { %v607_v7 = vpop.permute.xlu0 %606 }
 0x167   :  { %v555_v52 = vadd.f32 %v539_v51, %v455_v50 }
 0x169   :  { %v571_v15 = vmax.f32 %v555_v52, 0.0 }
 0x16a   :  { %v612_v38 = vpop.permute.xlu1 %611 }
 0x16b   :  { %v1103_v45 = vpack.c.bf16 %v571_v15, %v570_v8  ;;  %v622_v44 = vpop.permute.xlu0 %621 }
 0x16d   :  { %1104 = vmatprep.subr.bf16.mxu0 %v1103_v45  ;;  %1114 = vmatprep.subr.bf16.mxu1 %v1103_v45 }
 0x16e   :  { %1106 = vmatpush3.bf16.msra.mxu0 %v1103_v45  ;;  %1122 = vmatpush3.bf16.msra.mxu1 %v1103_v45  ;;  %v617_v56 = vpop.permute.xlu1 %616 }
 0x16f   :  { %v869_v35 = vpop.permute.xlu0 %868 }
 0x171   :  { %1052 = vmatmul.mubr.f32.vlgmr.msra.gmra.mrb[0].mxu0 %v573_v0  ;;  %1064 = vmatmul.mubr.f32.vlgmr.msra.gmra.mrb[0].mxu1 %v581_v29 }
 0x172   :  { %1054 = vmatprep.mubr.f32.mxu0 %v574_v27  ;;  %1066 = vmatprep.mubr.f32.mxu1 %v582_v16  ;;  %v864_v11 = vpop.permute.xlu1 %863 }
 0x173   :  { %v874_v28 = vpop.permute.xlu0 %873 }
 0x175   :  { %1055 = vmatmul.mubr.f32.gmra.mrb[2].mxu0 %v575_v13  ;;  %1067 = vmatmul.mubr.f32.gmra.mrb[2].mxu1 %v583_v61 }
 0x176   :  { %1057 = vmatprep.mubr.f32.mxu0 %v576_v21  ;;  %1069 = vmatprep.mubr.f32.mxu1 %v584_v18  ;;  %v627_v53 = vpop.permute.xlu1 %626 }
 0x177   :  { %v879_v2 = vpop.permute.xlu0 %878 }
 0x179   :  { %1058 = vmatmul.mubr.f32.gmra.mrb[4].mxu0 %v577_v5  ;;  %1070 = vmatmul.mubr.f32.gmra.mrb[4].mxu1 %v585_v22 }
 0x17a   :  { %1060 = vmatprep.mubr.f32.mxu0 %v578_v23  ;;  %1072 = vmatprep.mubr.f32.mxu1 %v586_v1 }
 0x17c   :  { %v632_v30 = vpop.permute.xlu1 %631  ;;  %v884_v40 = vpop.permute.xlu0 %883 }
 0x17d   :  { %1061 = vmatmul.mubr.f32.gmra.mrb[6].mxu0 %v579_v36  ;;  %1073 = vmatmul.mubr.f32.gmra.mrb[6].mxu1 %v587_v39 }
 0x180   :  { %v637_v17 = vpop.permute.xlu1 %636  ;;  %v889_v34 = vpop.permute.xlu0 %888 }
 0x184   :  { %v642_v12 = vpop.permute.xlu1 %641  ;;  %v894_v9 = vpop.permute.xlu0 %893 }
 0x188   :  { %v647_v26 = vpop.permute.xlu1 %646  ;;  %v899_v57 = vpop.permute.xlu0 %898 }
 0x18c   :  { %v652_v42 = vpop.permute.xlu1 %651  ;;  %v904_v32 = vpop.permute.xlu0 %903 }
 0x190   :  { %v657_v43 = vpop.permute.xlu1 %656  ;;  %v909_v46 = vpop.permute.xlu0 %908 }
 0x194   :  { %v662_v37 = vpop.permute.xlu1 %661  ;;  %v914_v45 = vpop.permute.xlu0 %913 }
 0x198   :  { %v667_v58 = vpop.permute.xlu1 %666 }
 0x19c   :  { %v672_v39 = vpop.permute.xlu1 %671 }
 0x244   :  { %v1053_v6 = vpop.f32.mrb[0].mxu0  ;;  %v1065_v10 = vpop.f32.mrb[0].mxu1 }
 0x245   :  { %v756_v54 = vadd.f32 %v1053_v6, %v612_v38  ;;  %v750_v14 = vpop.f32.mrb[1].mxu0  ;;  %v790_v63 = vpop.f32.mrb[1].mxu1  ;;  %v796_v38 = vadd.f32 %v1065_v10, %v652_v42 }
 0x246   :  { %v751_v41 = vadd.f32 %v750_v14, %v607_v7  ;;  %v791_v22 = vadd.f32 %v790_v63, %v647_v26 }
 0x247   :  { %v830_v47 = vmax.f32 %v756_v54, 0.0  ;;  %v838_v6 = vmax.f32 %v796_v38, 0.0 }
 0x248   :  { %v829_v24 = vmax.f32 %v751_v41, 0.0  ;;  %v1056_v48 = vpop.f32.mrb[2].mxu0  ;;  %v1068_v60 = vpop.f32.mrb[2].mxu1 }
 0x249   :  { %v942_v20 = vmul.f32 %v869_v35, %v830_v47  ;;  %v766_v4 = vadd.f32 %v1056_v48, %v622_v44  ;;  %v760_v55 = vpop.f32.mrb[3].mxu0  ;;  %v800_v19 = vpop.f32.mrb[3].mxu1  ;;  %v806_v54 = vadd.f32 %v1068_v60, %v662_v37  ;;  %v950_v42 = vmul.f32 %v909_v46, %v838_v6 }
 0x24a   :  { %v941_v33 = vmul.f32 %v864_v11, %v829_v24  ;;  %v761_v62 = vadd.f32 %v760_v55, %v617_v56  ;;  %v919_v35 = vpop.permute.xlu0 %918  ;;  %v677_v41 = vpop.permute.xlu1 %676 }
 0x24b   :  { %v832_v59 = vmax.f32 %v766_v4, 0.0 }
 0x24c   :  { %v957_v25 = vadd.f32 %v942_v20, %v941_v33  ;;  %v831_v3 = vmax.f32 %v761_v62, 0.0  ;;  %v1059_v31 = vpop.f32.mrb[4].mxu0  ;;  %v1071_v49 = vpop.f32.mrb[4].mxu1 }
 0x24d   :  { %v776_v50 = vadd.f32 %v1059_v31, %v632_v30  ;;  %v770_v51 = vpop.f32.mrb[5].mxu0  ;;  %v810_v52 = vpop.f32.mrb[5].mxu1  ;;  %v944_v0 = vmul.f32 %v879_v2, %v832_v59  ;;  %v816_v10 = vadd.f32 %v1071_v49, %v672_v39 }
 0x24e   :  { %v943_v8 = vmul.f32 %v874_v28, %v831_v3  ;;  %v771_v15 = vadd.f32 %v770_v51, %v627_v53  ;;  %v837_v53 = vmax.f32 %v791_v22, 0.0  ;;  %v801_v28 = vadd.f32 %v800_v19, %v657_v43  ;;  %v924_v47 = vpop.permute.xlu0 %923 }
 0x24f   :  { %v834_v27 = vmax.f32 %v776_v50, 0.0  ;;  %v811_v63 = vadd.f32 %v810_v52, %v667_v58  ;;  %v842_v19 = vmax.f32 %v816_v10, 0.0 }
 0x250   :  { %v958_v29 = vadd.f32 %v957_v25, %v943_v8  ;;  %v833_v16 = vmax.f32 %v771_v15, 0.0  ;;  %v1062_v13 = vpop.f32.mrb[6].mxu0  ;;  %v1074_v61 = vpop.f32.mrb[6].mxu1  ;;  %v949_v26 = vmul.f32 %v904_v32, %v837_v53 }
 0x251   :  { %v786_v21 = vadd.f32 %v1062_v13, %v642_v12  ;;  %v780_v18 = vpop.f32.mrb[7].mxu0  ;;  %v820_v5 = vpop.f32.mrb[7].mxu1  ;;  %v946_v7 = vmul.f32 %v889_v34, %v834_v27  ;;  %v840_v34 = vmax.f32 %v806_v54, 0.0  ;;  %v841_v20 = vmax.f32 %v811_v63, 0.0 }
 0x252   :  { %v945_v23 = vmul.f32 %v884_v40, %v833_v16  ;;  %v959_v1 = vadd.f32 %v958_v29, %v944_v0  ;;  %v781_v36 = vadd.f32 %v780_v18, %v637_v17  ;;  %v839_v40 = vmax.f32 %v801_v28, 0.0  ;;  %v929_v60 = vpop.permute.xlu0 %928 }
 0x253   :  { %v836_v44 = vmax.f32 %v786_v21, 0.0  ;;  %v821_v43 = vadd.f32 %v820_v5, %v677_v41  ;;  %v952_v55 = vmul.f32 %v919_v35, %v840_v34  ;;  %v953_v33 = vmul.f32 %v924_v47, %v841_v20 }
 0x254   :  { %v960_v56 = vadd.f32 %v959_v1, %v945_v23  ;;  %v835_v11 = vmax.f32 %v781_v36, 0.0  ;;  %v951_v48 = vmul.f32 %v914_v45, %v839_v40  ;;  %v954_v58 = vmul.f32 %v929_v60, %v842_v19 }
 0x255   :  { %v948_v12 = vmul.f32 %v899_v57, %v836_v44  ;;  %v843_v32 = vmax.f32 %v821_v43, 0.0  ;;  %v979_v27 = vstv %s1767_s6 }
 0x256   :  { %v947_v30 = vmul.f32 %v894_v9, %v835_v11  ;;  %v961_v2 = vadd.f32 %v960_v56, %v946_v7  ;;  %v682_v9 = vpop.permute.xlu1 %681  ;;  %v939_v49 = vpop.permute.xlu0 %938 }
 0x257   :  { %v826_v37 = vadd.f32 %v1074_v61, %v682_v9 }
 0x258   :  { %v962_v14 = vadd.f32 %v961_v2, %v947_v30 }
 0x259   :  { %v844_v25 = vmax.f32 %v826_v37, 0.0 }
 0x25a   :  { %v963_v17 = vadd.f32 %v962_v14, %v948_v12  ;;  %v934_v46 = vpop.permute.xlu1 %933 }
 0x25b   :  { %v955_v3 = vmul.f32 %v934_v46, %v843_v32  ;;  %v956_v50 = vmul.f32 %v939_v49, %v844_v25 }
 0x25c   :  { %v964_v24 = vadd.f32 %v963_v17, %v949_v26 }
 0x25e   :  { %v965_v4 = vadd.f32 %v964_v24, %v950_v42 }
 0x260   :  { %v966_v57 = vadd.f32 %v965_v4, %v951_v48 }
 0x262   :  { %v967_v62 = vadd.f32 %v966_v57, %v952_v55 }
 0x264   :  { %v968_v59 = vadd.f32 %v967_v62, %v953_v33 }
 0x266   :  { %v969_v31 = vadd.f32 %v968_v59, %v954_v58 }
 0x268   :  { %v970_v51 = vadd.f32 %v969_v31, %v955_v3 }
 0x26a   :  { %v971_v52 = vadd.f32 %v970_v51, %v956_v50 }
 0x26c   :  { %v972_v8 = vrot.slane %v971_v52, 4 }
 0x26e   :  { %v973_v15 = vadd.f32 %v972_v8, %v971_v52 }
 0x270   :  { %v974_v45 = vrot.slane %v973_v15, 2 }
 0x272   :  { %v975_v0 = vadd.f32 %v974_v45, %v973_v15 }
 0x274   :  { %v976_v29 = vrot.slane %v975_v0, 1 }
 0x276   :  { %v977_v16 = vadd.f32 %v976_v29, %v975_v0 }
 0x278   :  { %v980_v13 = vadd.f32 %v979_v27, %v977_v16 }
 0x27a   :  { %1166 = vtanh.f32 %v980_v13 }
 0x284   :  { %v1167_v61 = vpop.eup %1166 }
 0x285   :  { %982 = vst [vmem:[%s1768_s7] sm:$0x1] %v1167_v61 }

</bundles_post_ra>
